<compile_context>
chip_gen: v5e
topology: v5e:2x2
jax: 0.10.0
libtpu: 0.0.40
codegen_flags: <defaults>
</compile_context>

<pallas_src>
import math
import jax
import jax.numpy as jnp
from jax.experimental import pallas as pl
from jax.experimental.pallas import tpu as pltpu


# ---------------------------------------------------------------------------
# Kernel
# ---------------------------------------------------------------------------
def _gcn_kernel(inv_len_ref, text_ref, rpd_ref, w_ref, b_ref, out_ref):
    # inv_len_ref : (B,)           f32  SMEM (scalar prefetch, 1/length)
    # text_ref    : (Bt*N, Fin)    f32  VMEM (pre-flattened in the wrapper)
    # rpd_ref     : (Bt, N, N)     f32  VMEM
    # w_ref       : (Fin, Fp)      bf16 VMEM (Fout zero-padded to Fp = k*128)
    # b_ref       : (1, Fp)        f32  VMEM
    # out_ref     : (Bt, N, Fp)    f32  VMEM
    bblk = pl.program_id(0)
    Bt, N, _ = rpd_ref.shape
    Fp = w_ref.shape[1]

    # First matmul once per block, flattened so the MXU sees (Bt*N, Fin) @ (Fin, Fp).
    # bf16 inputs, f32 accumulation (deliberate precision choice, see header).
    hidden = jnp.dot(text_ref[...].astype(jnp.bfloat16), w_ref[...],
                     preferred_element_type=jnp.float32)          # (Bt*N, Fp) f32
    hidden_b = hidden.reshape(Bt, N, Fp).astype(jnp.bfloat16)     # bf16 for 2nd matmul

    # Second (batched) matmul: rpd @ hidden, f32 accumulation on the MXU.
    # rpd is cast to bf16 here (in VMEM) -- no extra HBM pass in the wrapper.
    agg = jnp.einsum("bnm,bmf->bnf", rpd_ref[...].astype(jnp.bfloat16), hidden_b,
                     preferred_element_type=jnp.float32)          # (Bt, N, Fp) f32

    # Per-batch 1/length as a (Bt, 1, 1) vector (Bt scalar SMEM reads, Bt small
    # & static), then ONE fused scale + bias + store for the whole block.
    inv = jnp.stack([inv_len_ref[bblk * Bt + i] for i in range(Bt)]
                    ).reshape(Bt, 1, 1)                           # (Bt, 1, 1) f32
    out_ref[...] = agg * inv + b_ref[...]                         # bias (1, Fp) bcast


# ---------------------------------------------------------------------------
# Block-size / VMEM planning
# ---------------------------------------------------------------------------
def _vmem_capacity_bytes():
    try:
        info = pltpu.get_tpu_info()
        cap = getattr(info, "vmem_capacity_bytes", None)
        if cap:
            return int(cap)
    except Exception:
        pass
    return 64 * 1024 * 1024          # conservative default (v7x per-TC VMEM)


def _plan_block(B, N, Fin, Fp):
    """Pick Bt from a VMEM budget and return (Bt, vmem_limit_bytes)."""
    cap = _vmem_capacity_bytes()
    budget = int(cap * 0.8)

    # Per extra batch in the block: double-buffered pipeline tiles + in-kernel
    # temporaries (bf16 copies of text/rpd, hidden f32, hidden bf16, agg f32).
    per_batch = (2 * N * Fin * 4          # text f32, 2 buffers
                 + 2 * N * N * 4          # rpd  f32, 2 buffers
                 + 2 * N * Fp * 4         # out  f32, 2 buffers
                 + N * Fin * 2            # text bf16 copy
                 + N * N * 2              # rpd  bf16 copy
                 + N * Fp * (4 + 2 + 4))  # hidden f32 + hidden bf16 + agg f32
    const = 2 * Fin * Fp * 2 + 2 * Fp * 4   # resident weight (bf16) + bias (f32)

    bt_cap = max(1, (budget - const) // per_batch)
    # Keep the "parallel" grid axis >= 2 steps when B >= 2 (v7x has 2 TCs).
    bt_cap = min(bt_cap, max(1, B // 2))

    bt = 1
    for d in range(1, B + 1):              # largest divisor of B <= bt_cap
        if B % d == 0 and d <= bt_cap:
            bt = d

    need = const + bt * per_batch
    vmem_limit = int(min(cap - (4 << 20), max(need + (8 << 20), 32 << 20)))
    return bt, vmem_limit


# ---------------------------------------------------------------------------
# Wrapper
# ---------------------------------------------------------------------------
def graph_convolution(text, rpd, length, weight, bias, *, block_b=None):
    """text: [B, N, Fin], rpd: [B, N, N], length: [B] (>0), weight: [Fin, Fout],
    bias: [Fout] -> output [B, N, Fout] f32."""
    B, N, Fin = text.shape
    Fout = weight.shape[1]
    Fp = pl.cdiv(Fout, 128) * 128                    # lane-dense padded feature dim

    Bt, vmem_limit = _plan_block(B, N, Fin, Fp)
    if block_b is not None:
        Bt = block_b
    assert B % Bt == 0

    # Zero-padded parameters (zero columns -> exact result on [:, :Fout]).
    w_pad = jnp.zeros((Fin, Fp), jnp.bfloat16).at[:, :Fout].set(
        weight.astype(jnp.bfloat16))
    b_pad = jnp.zeros((1, Fp), jnp.float32).at[:, :Fout].set(
        bias.astype(jnp.float32))

    # Flatten text in the wrapper (contiguous reshape -> no data movement).
    text2d = text.astype(jnp.float32).reshape(B * N, Fin)
    rpd_f = rpd.astype(jnp.float32)                  # no standalone bf16 convert
    # Note: assumes length > 0 (upstream concern; 1/length would be inf otherwise).
    inv_len = (1.0 / length).astype(jnp.float32)

    out_padded = pl.pallas_call(
        _gcn_kernel,
        out_shape=jax.ShapeDtypeStruct((B, N, Fp), jnp.float32),
        grid_spec=pltpu.PrefetchScalarGridSpec(
            num_scalar_prefetch=1,                   # inv_len -> SMEM once
            grid=(B // Bt,),
            in_specs=[
                pl.BlockSpec((Bt * N, Fin), lambda b, inv: (b, 0)),
                pl.BlockSpec((Bt, N, N),    lambda b, inv: (b, 0, 0)),
                pl.BlockSpec((Fin, Fp),     lambda b, inv: (0, 0)),   # resident
                pl.BlockSpec((1, Fp),       lambda b, inv: (0, 0)),   # resident
            ],
            out_specs=pl.BlockSpec((Bt, N, Fp), lambda b, inv: (b, 0, 0)),
        ),
        compiler_params=pltpu.CompilerParams(
            dimension_semantics=("parallel",),
            vmem_limit_bytes=vmem_limit),
    )(inv_len, text2d, rpd_f, w_pad, b_pad)

    return out_padded[..., :Fout]


# ---------------------------------------------------------------------------
# Self-test
# ---------------------------------------------------------------------------
if __name__ == "__main__":
    # Small shapes consistent with the module's forward pass.
    B, N, Fin, Fout = 2, 16, 32, 32

    key = jax.random.PRNGKey(0)
    k_text, k_rpd, k_len, k_w, k_b = jax.random.split(key, 5)

    text = jax.random.normal(k_text, (B, N, Fin), dtype=jnp.float32)
    rpd = jax.random.normal(k_rpd, (B, N, N), dtype=jnp.float32)
    length = jax.random.uniform(k_len, (B,), minval=1.0, maxval=float(N),
                                dtype=jnp.float32)

    # Deterministic parameter init mimicking reset_parameters():
    # uniform(-stdv, stdv) with stdv = 1/sqrt(out_features)
    stdv = 1.0 / math.sqrt(Fout)
    weight = jax.random.uniform(k_w, (Fin, Fout), minval=-stdv, maxval=stdv,
                                dtype=jnp.float32)
    bias = jax.random.uniform(k_b, (Fout,), minval=-stdv, maxval=stdv,
                              dtype=jnp.float32)

    out = graph_convolution(text, rpd, length, weight, bias)
    out = jax.block_until_ready(out)
    assert out.shape == (B, N, Fout)

    inv_len = 1.0 / length

    # Reference computed with the same bf16 matmul inputs / f32 accumulation
    # (tight tolerance).
    tb = text.astype(jnp.bfloat16)
    rb = rpd.astype(jnp.bfloat16)
    wb = weight.astype(jnp.bfloat16)
    hidden_bf = jnp.einsum("bnf,fo->bno", tb, wb,
                           preferred_element_type=jnp.float32)
    agg_bf = jnp.einsum("bnm,bmo->bno", rb, hidden_bf.astype(jnp.bfloat16),
                        preferred_element_type=jnp.float32)
    ref_bf = agg_bf * inv_len[:, None, None] + bias[None, None, :]
    assert jnp.allclose(out, ref_bf, atol=1e-2, rtol=1e-2)

    # Full-f32 reference (semantic sanity check, looser tolerance for bf16 matmuls).
    hidden_f32 = jnp.einsum("bnf,fo->bno", text, weight)
    ref_f32 = (jnp.einsum("bnm,bmo->bno", rpd, hidden_f32)
               / length[:, None, None] + bias[None, None, :])
    assert jnp.allclose(out, ref_f32, atol=0.1, rtol=0.05)

    print("KERNEL_OK")
</pallas_src>

<mosaic_0001>
module attributes {stable_mosaic.version = 11 : i64} {
  func.func @_gcn_kernel(%arg0: i32, %arg1: memref<2xf32, #tpu.memory_space<smem>>, %arg2: memref<16x32xf32, #tpu.memory_space<vmem>>, %arg3: memref<1x16x16xf32, #tpu.memory_space<vmem>>, %arg4: memref<32x128xbf16, #tpu.memory_space<vmem>>, %arg5: memref<1x128xf32, #tpu.memory_space<vmem>>, %arg6: memref<1x16x128xf32, #tpu.memory_space<vmem>>) attributes {dimension_semantics = [#tpu.dimension_semantics<parallel>], iteration_bounds = array<i64: 2>, scalar_prefetch = 1 : i64, scratch_operands = 0 : i64, tpu.core_type = #tpu.core_type<tc>, window_params = [{transform_indices = @transform_0, window_bounds = array<i64: 16, 32>}, {transform_indices = @transform_1, window_bounds = array<i64: 1, 16, 16>}, {pipeline_mode = #tpu.pipeline_mode<synchronous>, transform_indices = @transform_2, window_bounds = array<i64: 32, 128>}, {pipeline_mode = #tpu.pipeline_mode<synchronous>, transform_indices = @transform_3, window_bounds = array<i64: 1, 128>}, {transform_indices = @transform_4, window_bounds = array<i64: 1, 16, 128>}]} {
    %c0 = arith.constant 0 : index
    %c0_0 = arith.constant 0 : index
    %0 = vector.load %arg2[%c0, %c0_0] : memref<16x32xf32, #tpu.memory_space<vmem>>, vector<16x32xf32>
    %1 = arith.truncf %0 : vector<16x32xf32> to vector<16x32xbf16>
    %c0_1 = arith.constant 0 : index
    %c0_2 = arith.constant 0 : index
    %2 = vector.load %arg4[%c0_1, %c0_2] : memref<32x128xbf16, #tpu.memory_space<vmem>>, vector<32x128xbf16>
    %cst = arith.constant dense<0.000000e+00> : vector<16x128xf32>
    %3 = tpu.matmul %1, %2, %cst {dimension_numbers = #tpu.dot_dimension_numbers<[1], [0], [0], [1], [0, 0, 1, 1], [], []>} : vector<16x32xbf16>, vector<32x128xbf16>, vector<16x128xf32> -> vector<16x128xf32>
    %4 = vector.shape_cast %3 : vector<16x128xf32> to vector<1x16x128xf32>
    %5 = arith.truncf %4 : vector<1x16x128xf32> to vector<1x16x128xbf16>
    %c0_3 = arith.constant 0 : index
    %c0_4 = arith.constant 0 : index
    %c0_5 = arith.constant 0 : index
    %6 = vector.load %arg3[%c0_3, %c0_4, %c0_5] : memref<1x16x16xf32, #tpu.memory_space<vmem>>, vector<1x16x16xf32>
    %7 = arith.truncf %6 : vector<1x16x16xf32> to vector<1x16x16xbf16>
    "tpu.trace_start"() <{level = 10 : i32, message = "bnm,bmf->bnf"}> : () -> ()
    %cst_6 = arith.constant dense<0.000000e+00> : vector<1x16x128xf32>
    %8 = tpu.matmul %7, %5, %cst_6 {dimension_numbers = #tpu.dot_dimension_numbers<[2], [1], [1], [2], [0, 0, 0, 1, 1, 2], [0], [0]>} : vector<1x16x16xbf16>, vector<1x16x128xbf16>, vector<1x16x128xf32> -> vector<1x16x128xf32>
    "tpu.trace_stop"() : () -> ()
    %c1_i32 = arith.constant 1 : i32
    %9 = arith.muli %arg0, %c1_i32 : i32
    %c0_i32 = arith.constant 0 : i32
    %10 = arith.addi %9, %c0_i32 : i32
    %11 = arith.index_cast %10 : i32 to index
    %12 = memref.load %arg1[%11] : memref<2xf32, #tpu.memory_space<smem>>
    %13 = vector.broadcast %12 : f32 to vector<1xf32>
    %14 = vector.shape_cast %13 : vector<1xf32> to vector<1x1x1xf32>
    %15 = vector.broadcast %14 : vector<1x1x1xf32> to vector<1x16x128xf32>
    %16 = arith.mulf %8, %15 : vector<1x16x128xf32>
    %c0_7 = arith.constant 0 : index
    %c0_8 = arith.constant 0 : index
    %17 = vector.load %arg5[%c0_7, %c0_8] : memref<1x128xf32, #tpu.memory_space<vmem>>, vector<1x128xf32>
    %18 = vector.shape_cast %17 : vector<1x128xf32> to vector<1x1x128xf32>
    %19 = vector.broadcast %18 : vector<1x1x128xf32> to vector<1x16x128xf32>
    %20 = arith.addf %16, %19 : vector<1x16x128xf32>
    %c0_9 = arith.constant 0 : index
    %c0_10 = arith.constant 0 : index
    %c0_11 = arith.constant 0 : index
    %21 = vector.load %arg6[%c0_9, %c0_10, %c0_11] : memref<1x16x128xf32, #tpu.memory_space<vmem>>, vector<1x16x128xf32>
    tpu.vector_store %arg6[%c0_9, %c0_10, %c0_11], %20 {strides = array<i32>} : memref<1x16x128xf32, #tpu.memory_space<vmem>>, vector<1x16x128xf32>,
    return
  }
  func.func @transform_0(%arg0: i32, %arg1: memref<2xf32, #tpu.memory_space<smem>>) -> (i32, i32) {
    %c0_i32 = arith.constant 0 : i32
    %c0_i32_0 = arith.constant 0 : i32
    return %arg0, %c0_i32 : i32, i32
  }
  func.func @transform_1(%arg0: i32, %arg1: memref<2xf32, #tpu.memory_space<smem>>) -> (i32, i32, i32) {
    %c0_i32 = arith.constant 0 : i32
    %c0_i32_0 = arith.constant 0 : i32
    %c0_i32_1 = arith.constant 0 : i32
    return %arg0, %c0_i32, %c0_i32_0 : i32, i32, i32
  }
  func.func @transform_2(%arg0: i32, %arg1: memref<2xf32, #tpu.memory_space<smem>>) -> (i32, i32) {
    %c0_i32 = arith.constant 0 : i32
    %c0_i32_0 = arith.constant 0 : i32
    %c0_i32_1 = arith.constant 0 : i32
    return %c0_i32, %c0_i32_0 : i32, i32
  }
  func.func @transform_3(%arg0: i32, %arg1: memref<2xf32, #tpu.memory_space<smem>>) -> (i32, i32) {
    %c0_i32 = arith.constant 0 : i32
    %c0_i32_0 = arith.constant 0 : i32
    %c0_i32_1 = arith.constant 0 : i32
    return %c0_i32, %c0_i32_0 : i32, i32
  }
  func.func @transform_4(%arg0: i32, %arg1: memref<2xf32, #tpu.memory_space<smem>>) -> (i32, i32, i32) {
    %c0_i32 = arith.constant 0 : i32
    %c0_i32_0 = arith.constant 0 : i32
    %c0_i32_1 = arith.constant 0 : i32
    return %arg0, %c0_i32, %c0_i32_0 : i32, i32, i32
  }
}

</mosaic_0001>

<bundles_post_ra>
// kernel: tpu_custom_call.1
= control target key start
LH: loop header
LB: loop body
LE: loop exit
PB: predicated region body
PF: predicated region fallthrough
CT: control target
= control target key end

     0   :  { %s777_s21 = smov [#allocation3]   ;;  %s994_s0 = inlined_call_operand.hbm [shape: f32[2], index: 0, kind: input, shape index: {}]   ;;  %s995_s1 = inlined_call_operand.hbm [shape: f32[32,32], index: 1, kind: input, shape index: {}]   ;;  %s996_s2 = inlined_call_operand.hbm [shape: f32[2,16,16], index: 2, kind: input, shape index: {}]   ;;  %s997_s3 = inlined_call_operand.hbm [shape: bf16[32,128], index: 3, kind: input, shape index: {}]   ;;  %s998_s4 = inlined_call_operand.vmem [shape: f32[1,128], index: 4, kind: input, shape index: {}]   ;;  %s999_s5 = inlined_call_operand.hbm [shape: f32[2,16,128], index: 5, kind: output, shape index: {}]  }
   0x1   :  { %1000 = sst [smem:[#allocation17_spill]] %s995_s1  ;;  %s11_s20 = sshll.u32 %s994_s0, 4  ;;  %s12_s20 = int_to_ptr.hbm [resolvable:$true] %s11_s20 }
   0x2   :  { %1001 = sst [smem:[#allocation18_spill]] %s997_s3 }
   0x3   :  { %14 = dma.hbm_to_smem %s12_s20, 16, %s777_s21, [#allocation2] }
   0x4   :  { %743 = dma.done.wait [#allocation2], 16 }
   0x5   :  { %744 = vsyncadd [#allocation2], 4294967280 }
   0x6   :  { %17 = sfence }
   0x7   :  { %18 = vsyncpa [#allocation5], 0 }
   0x8   :  { %20 = vsyncpa [#allocation5 + $0x1], 0 }
   0x9   :  { %21 = vsyncpa [#allocation8], 0 }
   0xa   :  { %23 = vsyncpa [#allocation8 + $0x1], 0 }
   0xb   :  { %24 = vsyncpa [#allocation6], 0 }
   0xc   :  { %26 = vsyncpa [#allocation6 + $0x1], 0  ;;  %s818_s22 = smov 0   ;;  %s820_s23 = smov 0  }
   0xd   :  { %s822_s24 = smov 0   ;;  %s824_s25 = smov 0  }
   0xe LB: > { %s839_s0 = sadd.s32 4294967295, %s775_s25   ;;  %s492_s26 = sadd.s32 4294967294, %s775_s25   ;;  %s775_s25 = sphi %s824_s25, %s1015_s25   ;;  %s771_s24 = sphi %s822_s24, %s1014_s24   ;;  %s767_s23 = sphi %s820_s23, %s1013_s23   ;;  %s763_s22 = sphi %s818_s22, %s1012_s22  }
   0xf   : > { %p52_p0 = scmp.ne.s32.totalorder %s767_s23, %s763_s22  ;;  %p53_p1 = scmp.eq.s32.totalorder %s839_s0, 0 }
  0x10   : > { %p144_p2 = scmp.eq.s32.totalorder %s839_s0, 1  ;;  %p150_p3 = scmp.eq.s32.totalorder %s492_s26, 1 }
  0x11   : > { %p848_p4 = por %p53_p1, %p52_p0  ;;  %p493_p5 = scmp.ge.s32.totalorder %s775_s25, 1 }
  0x12   : > { %p853_p6 = por %p150_p3, %p52_p0  ;;  %p157_p7 = scmp.lt.s32.totalorder %s775_s25, 3 }
  0x13   : > { %s1004_s3 = sld [smem:[#allocation18_spill]]  ;;  %s778_s8 = smov [#allocation9]  }
  0x14   : > { %p861_p8 = pnand %p493_p5, %p157_p7  ;;  %s170_s9 = sshll.u32 %s778_s8, 4  ;;  %s171_s9 = int_to_ptr.vmem [resolvable:$true] %s170_s9 }
  0x15   : > { %s871_s10 = sadd.s32 1, %s775_s25   ;;  %s779_s11 = smov 64  }
  0x16   : > { %p537_p9 = pneg %p861_p8  ;;  %s780_s12 = smov 4  }
  0x17   : > { %s36_s13 = ssub.s32 %s775_s25, %s871_s10  ;;  %s39_s14 = sadd.s32 1, %s771_s24 }
  0x18   : > { %p538_p10 = pnand %p537_p9, %p53_p1  ;;  %p37_p12 = scmp.eq.s32.totalorder %s36_s13, 0 }
  0x19   : > { %s168_s6 = sshll.u32 %s1004_s3, 4  ;;  %p46_p13 = scmp.ne.s32.totalorder %s771_s24, %s767_s23  ;;  %s169_s6 = int_to_ptr.hbm [resolvable:$true] %s168_s6 }
  0x1a   : > { %540 = dma.hbm_to_vmem [thread:$0]  (!%p538_p10), %s169_s6, 256, %s171_s9, [#allocation8], %s779_s11, %s779_s11, %s780_s12  }
  0x1b   : > { %p47_p0 = scmp.eq.s32.totalorder %s775_s25, 0  ;;  %p553_p3 = scmp.lt.s32.totalorder %s775_s25, 2 }
  0x1c   : > { %s881_s15 = scalar_select %p37_p12, %s771_s24, %s39_s14  }
  0x1d   : > { %p48_p5 = por %p47_p0, %p46_p13  ;;  %p885_p7 = por %p144_p2, %p46_p13 }
  0x1e   : > { %1006 = sst [smem:[#allocation16_spill]] %s881_s15  ;;  %s187_s17 = sand.u32 1, %s771_s24  }
  0x1f   : > { %s522_s18 = sshll.u32 %s775_s25, 4  ;;  %s891_s19 = sshll.u32 %s187_s17, 4 }
  0x20   : > { %s1008_s1 = sld [smem:[#allocation17_spill]]  ;;  %s191_s30 = scalar_lea.vmem [#allocation4], %s891_s19 }
  0x21   : > { %s199_s6 = sshll.u32 %s191_s30, 4  ;;  %p899_p9 = pnand %p553_p3, %p48_p5  ;;  %s200_s6 = int_to_ptr.vmem [resolvable:$true] %s199_s6 }
  0x22   : > { %s218_s12 = scalar_lea.hbm %s996_s2, %s522_s18  ;;  %s188_s13 = scalar_lea.sflag [#allocation5], %s187_s17 }
  0x23   : > { %p643_p10 = pneg %p899_p9 }
  0x26   : > { %s196_s26 = scalar_lea.hbm %s1008_s1, %s522_s18  ;;  %s646_s30 = scalar_lea.hbm %s1008_s1, 32 }
  0x27   : > { %s197_s29 = sshll.u32 %s196_s26, 4  ;;  %s198_s29 = int_to_ptr.hbm [resolvable:$true] %s197_s29 }
  0x28   : > { %s639_s14 = sshra.s32 %s198_s29, 4  ;;  %s640_s14 = int_to_ptr.hbm [resolvable:$true] %s639_s14 }
  0x29   : > { %s641_s20 = scalar_lea.hbm %s640_s14, 16  ;;  %p647_p0 = scmp.lt.s32.totalorder %s640_s14, %s1008_s1 }
  0x2a   : > { %p642_p2 = scmp.ne.s32.totalorder %s640_s14, %s641_s20  ;;  %p648_p3 = scmp.lt.s32.totalorder %s646_s30, %s641_s20 }
  0x2c   : > { %p644_p12 = pnand %p643_p10, %p642_p2  ;;  %p649_p5 = por %p648_p3, %p647_p0 }
  0x2e   : > { %p645_p13 = pneg %p644_p12 }
  0x30   : > { %p650_p11 = pnand %p649_p5, %p645_p13 }
  0x32   : > { %653 = shalt.err (!%p650_p11)
}
  0x33   : > { %s781_s17 = smov 128   ;;  %s782_s18 = smov 8  }
  0x34   : > { %544 = dma.hbm_to_vmem [thread:$0]  (!%p899_p9), %s198_s29, 256, %s200_s6, %s188_s13, %s781_s17, %s781_s17, %s782_s18  }
  0x35   : > { %s219_s11 = sshll.u32 %s218_s12, 4  ;;  %s213_s15 = scalar_lea.vmem [#allocation7], %s891_s19  ;;  %s220_s11 = int_to_ptr.hbm [resolvable:$true] %s219_s11 }
  0x36   : > { %s221_s21 = sshll.u32 %s213_s15, 4  ;;  %s209_s26 = sand.u32 1, %s775_s25   ;;  %s222_s21 = int_to_ptr.vmem [resolvable:$true] %s221_s21 }
  0x37   : > { %s210_s3 = scalar_lea.sflag [#allocation8], %s209_s26  ;;  %s669_s14 = sshra.s32 %s220_s11, 4  ;;  %s670_s14 = int_to_ptr.hbm [resolvable:$true] %s669_s14 }
  0x38   : > { %s671_s20 = scalar_lea.hbm %s670_s14, 16  ;;  %s676_s1 = scalar_lea.hbm %s996_s2, 32 }
  0x39   : > { %p672_p2 = scmp.ne.s32.totalorder %s670_s14, %s671_s20  ;;  %p677_p13 = scmp.lt.s32.totalorder %s670_s14, %s996_s2 }
  0x3a   : > { %p678_p0 = scmp.lt.s32.totalorder %s676_s1, %s671_s20 }
  0x3b   : > { %p674_p11 = pnand %p672_p2, %p643_p10 }
  0x3c   : > { %p679_p3 = por %p678_p0, %p677_p13 }
  0x3d   : > { %p675_p12 = pneg %p674_p11 }
  0x3f   : > { %p680_p5 = pnand %p679_p3, %p675_p12 }
  0x41   : > { %683 = shalt.err (!%p680_p5)
}
  0x42   : > { %547 = dma.hbm_to_vmem [thread:$0]  (!%p899_p9), %s220_s11, 256, %s222_s21, %s210_s3, %s781_s17, %s781_s17, %s782_s18  }
  0x43   : > { %233 = sbr.rel (%p861_p8) target bundleno = 371 (0x173), region = 36  ;;  %s935_s15 = sand.u32 (!%p861_p8), 1, %s767_s23  }
  0x44   : > { %s938_s19 = sshll.u32 (!%p861_p8), %s935_s15, 4  ;;  %s236_s12 = scalar_lea.sflag (!%p861_p8), [#allocation5], %s935_s15 }
  0x45   : > { %s239_s1 = scalar_lea.vmem (!%p861_p8), [#allocation4], %s938_s19 }
  0x48   : > { %746 = dma.done.wait (%p848_p4), %s236_s12, 256  }
  0x49   : > { %748 = vsyncadd (%p848_p4), %s236_s12, 4294967040  ;;  %s245_s7 = sand.u32 1, %s839_s0   ;;  %s249_s13 = scalar_lea.vmem [#allocation7], %s938_s19 }
  0x4a   : > { %s246_s8 = scalar_lea.sflag [#allocation8], %s245_s7 }
  0x4b   : > { %750 = dma.done.wait (%p848_p4), %s246_s8, 256  }
  0x4c   : > { %752 = vsyncadd (%p848_p4), %s246_s8, 4294967040 }
  0x4d   : > { %754 = dma.done.wait (%p53_p1), [#allocation8], 256  }
  0x4e   : > { %756 = vsyncadd (%p53_p1), [#allocation8], 4294967040  ;;  %v525_v0 = vld [vmem:[#allocation9 + $0x8] sm:$0xff]  ;;  %v524_v1 = vld [vmem:[#allocation9] sm:$0xff]  ;;  %vm306_vm0 = vcmask 261120   ;;  %vm341_vm1 = vcmask 130048  }
  0x4f   : > { %316 = vmatpush.bf16.msra.mxu0 %v525_v0  ;;  %v287_v2 = vld [vmem:[%s239_s1] sm:$0xff]  ;;  %v288_v3 = vld [vmem:[%s239_s1 + $0x8] sm:$0xff]  ;;  %s359_s27 = sld [smem:[#allocation3 + %s839_s0]]  ;;  %s526_s11 = sshll.u32 %s839_s0, 4 }
  0x50   : > { %v289_v4 = vpack.c.bf16 %v288_v3, %v287_v2  ;;  %v326_v6 = vld [vmem:[%s249_s13] sm:$0xff]  ;;  %v327_v7 = vld [vmem:[%s249_s13 + $0x8] sm:$0xff]  ;;  %s383_s3 = scalar_lea.hbm %s999_s5, %s526_s11  ;;  %s284_s14 = scalar_lea.vmem [#allocation10], %s938_s19 }
  0x51   : > { %v328_v8 = vpack.c.bf16 %v326_v6, %v326_v6  ;;  %v329_v9 = vpack.c.bf16 %v327_v7, %v327_v7  ;;  %v596_v20 = vld [vmem:[%s998_s4] ss:$0 sm:$0xff]  ;;  %s384_s20 = sshll.u32 %s284_s14, 4  ;;  %s386_s30 = sshll.u32 %s383_s3, 4  ;;  %s385_s20 = int_to_ptr.vmem [resolvable:$true] %s384_s20  ;;  %s387_s30 = int_to_ptr.hbm [resolvable:$true] %s386_s30 }
  0x52   : > { %s372_s9 = scalar_lea.sflag [#allocation6], %s935_s15  ;;  %s713_s29 = sshra.s32 %s387_s30, 4  ;;  %s714_s29 = int_to_ptr.hbm [resolvable:$true] %s713_s29 }
  0x53   : > { %317 = vmatpush.bf16.msra.mxu0 %v524_v1  ;;  %v332_v13 = vunpack.c.l.b16 %v328_v8  ;;  %v333_v14 = vunpack.c.l.b16 %v329_v9  ;;  %s715_s0 = scalar_lea.hbm %s714_s29, 16  ;;  %s719_s19 = scalar_lea.hbm %s999_s5, 32 }
  0x54   : > { %p716_p1 = scmp.ne.s32.totalorder %s714_s29, %s715_s0  ;;  %p720_p9 = scmp.lt.s32.totalorder %s714_s29, %s999_s5 }
  0x55   : > { %v334_v18 = vpack.c.b16 %v333_v14, %v332_v13  ;;  %v360_v19 = vstv %s359_s27  ;;  %p721_p10 = scmp.lt.s32.totalorder %s719_s19, %s715_s0 }
  0x56   : > { %515 = vmatmul.msk.bf16.vlgmr.msra.gmra.mxu0 %vm306_vm0, %v289_v4  ;;  %p717_p4 = pnand %p716_p1, %p885_p7 }
  0x57   : > { %p722_p2 = por %p721_p10, %p720_p9 }
  0x58   : > { %p718_p8 = pneg %p717_p4 }
  0x5a   : > { %p723_p11 = pnand %p722_p2, %p718_p8 }
  0xd3   : > { %v319_v5 = vpop.f32.mrf.mxu0 }
  0xd4   : > { %v324_v10 = vpack.c.bf16 %v319_v5, %v319_v5 }
  0xd6   : > { %v337_v15 = vunpack.c.l.b16 %v324_v10 }
  0xdb   : > { %v321_v11 = vpop.f32.mrf.mxu0 }
  0xdc   : > { %v325_v12 = vpack.c.bf16 %v321_v11, %v321_v11 }
  0xde   : > { %v338_v16 = vunpack.c.l.b16 %v325_v12 }
  0xe0   : > { %v339_v17 = vpack.c.b16 %v338_v16, %v337_v15 }
  0xe2   : > { %352 = vmatpush.bf16.msra.mxu1 %v339_v17 }
  0xe5   : > { %516 = vmatmul.msk.bf16.vlgmr.msra.gmra.mxu1 %vm341_vm1, %v334_v18 }
 0x162   : > { %v354_v21 = vpop.f32.mrf.mxu1 }
 0x163   : > { %v361_v22 = vmul.f32 %v360_v19, %v354_v21 }
 0x165   : > { %v367_v23 = vadd.f32 %v596_v20, %v361_v22 }
 0x167   : > { %369 = vst [vmem:[%s284_s14] sm:$0xff] %v367_v23 }
 0x16a   : > { %v356_v24 = vpop.f32.mrf.mxu1 }
 0x16b   : > { %v362_v25 = vmul.f32 %v360_v19, %v356_v24 }
 0x16d   : > { %v368_v26 = vadd.f32 %v596_v20, %v362_v25 }
 0x16f   : > { %370 = vst [vmem:[%s284_s14 + $0x8] sm:$0xff] %v368_v26 }
 0x170   : > { %726 = shalt.err (!%p723_p11)
}
 0x171   : > { %s783_s15 = smov 128   ;;  %s784_s8 = smov 8  }
 0x172   : > { %535 = dma.vmem_to_hbm [thread:$0]  (%p885_p7), %s385_s20, 256, %s387_s30, %s372_s9, %s783_s15, %s783_s15, %s784_s8  }
 0x173 PF: > { %s401_s13 = sand.u32 1, %s763_s22   ;;  %p1010_p12 = scmp.ge.s32.totalorder %s775_s25, 2 }
 0x174   : > { %s402_s27 = scalar_lea.sflag [#allocation6], %s401_s13 }
 0x175   : > { %p549_p13 = pnand %p1010_p12, %p853_p6 }
 0x177   : > { %p550_p0 = pneg %p549_p13 }
 0x179   : > { %758 = dma.done.wait (%p550_p0), %s402_s27, 256  }
 0x17a   : > { %760 = vsyncadd (%p550_p0), %s402_s27, 4294967040  ;;  %s1011_s17 = sld [smem:[#allocation16_spill]]  ;;  %p29_p3 = scmp.ge.s32.totalorder %s871_s10, 4  }
 0x17b   : > { %s1012_s22 = smov %s767_s23  ;;  %s1013_s23 = smov %s771_s24 }
 0x17c   : > { %s1015_s25 = smov %s871_s10  ;;  %31 = sbr.rel (!%p29_p3) target bundleno = 14 (0xe), region = 98 }
 0x180   : > { %s1014_s24 = smov %s1011_s17 }
 0x181   :  { %408 = vsyncpa [#allocation5], 1 }
 0x182   :  { %410 = vsyncpa [#allocation5 + $0x1], 1 }
 0x183   :  { %411 = vsyncpa [#allocation8], 1 }
 0x184   :  { %413 = vsyncpa [#allocation8 + $0x1], 1 }
 0x185   :  { %414 = vsyncpa [#allocation6], 1 }
 0x186   :  { %416 = vsyncpa [#allocation6 + $0x1], 1 }

</bundles_post_ra>
